<compile_context>
chip_gen: v7x
topology: tpu7x:2x2x1
jax: 0.10.0
libtpu: 0.0.40
codegen_flags: <defaults>
</compile_context>

<pallas_src>
from typing import Optional

import jax
import jax.numpy as jnp
from jax.experimental import pallas as pl
from jax.experimental.pallas import tpu as pltpu

LANES = 128


# --------------------------------------------------------------------------- #
# VMEM budgeting (per-chip)
# --------------------------------------------------------------------------- #
def _vmem_capacity_bytes() -> int:
    """Physical VMEM capacity; conservative (v7x) fallback if query fails."""
    try:
        cap = int(pltpu.get_tpu_info().vmem_capacity_bytes)
        if cap > 0:
            return cap
    except Exception:
        pass
    return 64 * 1024 * 1024  # v7x per-TensorCore VMEM (smallest of the fleet)


def _vmem_budget_bytes() -> int:
    # Working-set budget for (double-buffered inputs + f32 intermediates).
    cap = _vmem_capacity_bytes()
    return max(16 * 1024 * 1024, cap // 2)   # 32 MiB on v7x, 64 MiB on v5e/v6e


def _vmem_limit_bytes() -> int:
    # Scoped-VMEM limit passed to the compiler: budget + headroom for the
    # output tile, semaphores and compiler scratch, clamped below physical.
    cap = _vmem_capacity_bytes()
    return int(min(cap - 8 * 1024 * 1024, _vmem_budget_bytes() + 16 * 1024 * 1024))


def _choose_tile_n(n: int, c: int, itemsize: int) -> int:
    """Largest sublane-aligned row tile whose full working set fits the budget."""
    c_pad = ((c + LANES - 1) // LANES) * LANES           # lane padding of class dim
    per_row = (2 * c_pad * itemsize                      # double-buffered logits DMA
               + 6 * 4 * c_pad                           # ~6 full-width f32 temporaries
               + 2 * LANES * 4)                          # double-buffered padded targets
    t = _vmem_budget_bytes() // max(per_row, 1)
    t = max(32, (t // 32) * 32)                          # sublane-friendly
    if t >= n:
        return n                                         # single full-extent tile
    return t


# --------------------------------------------------------------------------- #
# Kernel
# --------------------------------------------------------------------------- #
def _make_kernel(n_total: int, tile_n: int, has_weight: bool, ragged: bool):
    def kernel(*refs):
        if has_weight:
            preds_ref, targets_ref, wvec_ref, out_ref = refs
        else:
            preds_ref, targets_ref, out_ref = refs

        x = preds_ref[...].astype(jnp.float32)             # (tile_n, C), cast in-kernel
        t = targets_ref[...]                               # (tile_n, 1) int32

        # ---- softmax statistics: single exp per element, per-row log only ----
        m = jnp.max(x, axis=1, keepdims=True)               # (tile_n, 1)
        z = x - m
        e = jnp.exp(z)                                       # (tile_n, C)  EUP once/elem
        s = jnp.sum(e, axis=1, keepdims=True)                # (tile_n, 1)
        log_s = jnp.log(s)                                   # (tile_n, 1)
        inv_s = pl.reciprocal(s, approx=False)               # exact; only (tile_n, 1)

        # ---- cross-entropy: boolean-mask select of z (and w) at the target ----
        cls = jax.lax.broadcasted_iota(jnp.int32, (1, x.shape[1]), 1)   # (1, C)
        mask = cls == t                                      # (tile_n, C) bool
        z_t = jnp.sum(jnp.where(mask, z, 0.0), axis=1, keepdims=True)
        nll = log_s - z_t                                    # (tile_n, 1)

        # ---- entropy = -sum(p * log p) = log(s) - sum(e*z)/s ----
        # TODO(synk): PyTorch uses log(p + 1e-9); this analytic form drops the
        # epsilon (difference is O(C * 1e-9), far below fp32 tolerance).
        ez = jnp.sum(e * z, axis=1, keepdims=True)           # (tile_n, 1)
        entropy = log_s - ez * inv_s                         # (tile_n, 1)

        if has_weight:
            w = wvec_ref[...].astype(jnp.float32)            # (1, C), resident
            w_t = jnp.sum(jnp.where(mask, w, 0.0), axis=1, keepdims=True)

        if ragged:
            # Only per-row results are masked (no per-element sanitize pass);
            # garbage in padded rows cannot leak because selects do not
            # propagate the untaken branch.
            row0 = pl.program_id(0) * tile_n
            ridx = row0 + jax.lax.broadcasted_iota(jnp.int32, (tile_n, 1), 0)
            valid = ridx < n_total                           # (tile_n, 1) bool
            nll = jnp.where(valid, nll, 0.0)
            entropy = jnp.where(valid, entropy, 0.0)
            if has_weight:
                w_t = jnp.where(valid, w_t, 0.0)

        if has_weight:
            s_nll = jnp.sum(w_t * nll)
            s_den = jnp.sum(w_t)
        else:
            # Denominator is the closed-form N, applied wrapper-side.
            s_nll = jnp.sum(nll)
            s_den = jnp.zeros((), jnp.float32)
        s_ent = jnp.sum(entropy)

        # Lane-dense partial-sum row: lane 0 = sum(w*nll), 1 = sum(w), 2 = sum(H).
        lane = jax.lax.broadcasted_iota(jnp.int32, (8, LANES), 1)
        out_ref[...] = jnp.where(lane == 0, s_nll,
                       jnp.where(lane == 1, s_den,
                       jnp.where(lane == 2, s_ent, 0.0))).astype(jnp.float32)

    return kernel


# --------------------------------------------------------------------------- #
# Wrapper
# --------------------------------------------------------------------------- #
def cross_entropy_with_entropy_min_loss(preds, targets, class_weight=None,
                                        weight_entropy: float = 1.0,
                                        tile_n: Optional[int] = None,
                                        logits_buffers: Optional[int] = None):
    """preds: (N, C) logits (f32 or bf16); targets: (N,) int class indices."""
    n, c = preds.shape
    if c <= 1:
        # TODO(synk): sigmoid fallback of the PyTorch module (C==1 / 1-D preds)
        # is not implemented in the Pallas path.
        raise NotImplementedError("kernel assumes (N, C) logits with C > 1")

    has_weight = class_weight is not None
    itemsize = jnp.dtype(preds.dtype).itemsize
    if tile_n is None:
        tile_n = _choose_tile_n(n, c, itemsize)
    tile_n = min(tile_n, n)
    num_tiles = pl.cdiv(n, tile_n)
    ragged = (n % tile_n) != 0          # static: mask path only when needed

    targets_2d = targets.astype(jnp.int32).reshape(n, 1)

    # Optional deeper pipelining on the logits stream (sweepable).
    logits_spec_kwargs = {}
    if logits_buffers is not None and logits_buffers != 2:
        logits_spec_kwargs["pipeline_mode"] = pl.Buffered(logits_buffers)

    in_specs = [
        pl.BlockSpec((tile_n, c), lambda i: (i, 0), **logits_spec_kwargs),  # native dtype
        pl.BlockSpec((tile_n, 1), lambda i: (i, 0)),                        # targets
        # TODO(synk): targets could be scalar-prefetched into SMEM / packed
        # lane-dense; the narrow per-step DMA is negligible at large tiles.
    ]
    args = [preds, targets_2d]
    if has_weight:
        in_specs.append(pl.BlockSpec((1, c), lambda i: (0, 0)))   # resident weights
        args.append(jnp.asarray(class_weight, jnp.float32).reshape(1, c))

    out = pl.pallas_call(
        _make_kernel(n, tile_n, has_weight, ragged),
        out_shape=jax.ShapeDtypeStruct((num_tiles * 8, LANES), jnp.float32),
        grid_spec=pltpu.PrefetchScalarGridSpec(
            num_scalar_prefetch=0,
            grid=(num_tiles,),
            in_specs=in_specs,
            out_specs=pl.BlockSpec((8, LANES), lambda i: (i, 0)),
        ),
        compiler_params=pltpu.CompilerParams(
            dimension_semantics=("parallel",),
            vmem_limit_bytes=_vmem_limit_bytes()),
    )(*args)

    # Tiny final combine in JAX (num_tiles x 3 scalars).
    parts = out.reshape(num_tiles, 8, LANES)[:, 0, :]
    s_nll = jnp.sum(parts[:, 0])
    s_ent = jnp.sum(parts[:, 2])
    if has_weight:
        ce = s_nll / jnp.sum(parts[:, 1])
    else:
        ce = s_nll / n
    return ce + weight_entropy * (s_ent / n)


# --------------------------------------------------------------------------- #
# Pure-JAX reference (mirror of the PyTorch module, softmax branch)
# --------------------------------------------------------------------------- #
def _reference(preds, targets, class_weight, weight_entropy):
    preds32 = preds.astype(jnp.float32)
    logp = jax.nn.log_softmax(preds32, axis=1)
    nll = -logp[jnp.arange(preds.shape[0]), targets]
    if class_weight is None:
        ce = nll.mean()
    else:
        w_t = class_weight[targets]
        ce = jnp.sum(w_t * nll) / jnp.sum(w_t)
    probs = jax.nn.softmax(preds32, axis=1)
    ent = -jnp.sum(probs * jnp.log(probs + 1e-9), axis=1)
    return ce + weight_entropy * ent.mean()


if __name__ == "__main__":
    key = jax.random.PRNGKey(0)
    k1, k2, k3, k4, k5, k6, k7 = jax.random.split(key, 7)

    # Case 1: weight=None, float32 logits (single full-extent tile).
    N, C = 8, 32
    preds = jax.random.normal(k1, (N, C), dtype=jnp.float32)
    targets = jax.random.randint(k2, (N,), 0, C, dtype=jnp.int32)
    loss = jax.block_until_ready(
        cross_entropy_with_entropy_min_loss(preds, targets, None, 1.0))
    ref = _reference(preds, targets, None, 1.0)
    assert jnp.allclose(loss, ref, rtol=1e-5, atol=1e-5), (loss, ref)

    # Case 2: per-class weights, float32 logits.
    cw = jax.random.uniform(k3, (C,), dtype=jnp.float32, minval=0.5, maxval=1.5)
    loss2 = jax.block_until_ready(
        cross_entropy_with_entropy_min_loss(preds, targets, cw, 0.5))
    ref2 = _reference(preds, targets, cw, 0.5)
    assert jnp.allclose(loss2, ref2, rtol=1e-5, atol=1e-5), (loss2, ref2)

    # Case 3: bf16 logits, multi-tile grid with a ragged last tile (masking path).
    N3, C3 = 24, 128
    preds3 = jax.random.normal(k4, (N3, C3), dtype=jnp.float32).astype(jnp.bfloat16)
    targets3 = jax.random.randint(k5, (N3,), 0, C3, dtype=jnp.int32)
    loss3 = jax.block_until_ready(
        cross_entropy_with_entropy_min_loss(preds3, targets3, None, 1.0, tile_n=16))
    ref3 = _reference(preds3, targets3, None, 1.0)
    assert jnp.allclose(loss3, ref3, rtol=1e-4, atol=1e-4), (loss3, ref3)

    # Case 4: C not a multiple of 128 (lane padding) + weights + ragged multi-tile.
    N4, C4 = 40, 100
    preds4 = jax.random.normal(k6, (N4, C4), dtype=jnp.float32)
    targets4 = jax.random.randint(k7, (N4,), 0, C4, dtype=jnp.int32)
    cw4 = jax.random.uniform(k3, (C4,), dtype=jnp.float32, minval=0.5, maxval=1.5)
    loss4 = jax.block_until_ready(
        cross_entropy_with_entropy_min_loss(preds4, targets4, cw4, 0.7, tile_n=16))
    ref4 = _reference(preds4, targets4, cw4, 0.7)
    assert jnp.allclose(loss4, ref4, rtol=1e-5, atol=1e-5), (loss4, ref4)

    print("KERNEL_OK")
</pallas_src>

<mosaic_0001>
module attributes {stable_mosaic.version = 11 : i64} {
  func.func @kernel(%arg0: i32, %arg1: memref<8x32xf32, #tpu.memory_space<vmem>>, %arg2: memref<8x1xi32, #tpu.memory_space<vmem>>, %arg3: memref<8x128xf32, #tpu.memory_space<vmem>>) attributes {dimension_semantics = [#tpu.dimension_semantics<parallel>], iteration_bounds = array<i64: 1>, scalar_prefetch = 0 : i64, scratch_operands = 0 : i64, tpu.core_type = #tpu.core_type<tc>, window_params = [{transform_indices = @transform_0, window_bounds = array<i64: 8, 32>}, {transform_indices = @transform_1, window_bounds = array<i64: 8, 1>}, {transform_indices = @transform_2, window_bounds = array<i64: 8, 128>}]} {
    %c0 = arith.constant 0 : index
    %c0_0 = arith.constant 0 : index
    %0 = vector.load %arg1[%c0, %c0_0] : memref<8x32xf32, #tpu.memory_space<vmem>>, vector<8x32xf32>
    %c0_1 = arith.constant 0 : index
    %c0_2 = arith.constant 0 : index
    %1 = vector.load %arg2[%c0_1, %c0_2] : memref<8x1xi32, #tpu.memory_space<vmem>>, vector<8x1xi32>
    %cst = arith.constant dense<0xFF800000> : vector<8xf32>
    %2 = vector.multi_reduction <maximumf>, %0, %cst [1] : vector<8x32xf32> to vector<8xf32>
    %3 = vector.shape_cast %2 : vector<8xf32> to vector<8x1xf32>
    %4 = vector.broadcast %3 : vector<8x1xf32> to vector<8x32xf32>
    %5 = arith.subf %0, %4 : vector<8x32xf32>
    %6 = math.exp %5 : vector<8x32xf32>
    %cst_3 = arith.constant dense<0.000000e+00> : vector<8xf32>
    %7 = vector.multi_reduction <add>, %6, %cst_3 [1] : vector<8x32xf32> to vector<8xf32>
    %8 = vector.shape_cast %7 : vector<8xf32> to vector<8x1xf32>
    %9 = math.log %8 : vector<8x1xf32>
    %10 = tpu.reciprocal %8 : vector<8x1xf32> -> vector<8x1xf32>
    %11 = tpu.iota {dimensions = array<i32: 1>} : vector<1x32xi32>
    %12 = vector.broadcast %11 : vector<1x32xi32> to vector<8x32xi32>
    %13 = vector.broadcast %1 : vector<8x1xi32> to vector<8x32xi32>
    %14 = arith.cmpi eq, %12, %13 : vector<8x32xi32>
    %cst_4 = arith.constant 0.000000e+00 : f32
    %15 = vector.broadcast %cst_4 : f32 to vector<8x32xf32>
    %16 = arith.select %14, %5, %15 : vector<8x32xi1>, vector<8x32xf32>
    %cst_5 = arith.constant dense<0.000000e+00> : vector<8xf32>
    %17 = vector.multi_reduction <add>, %16, %cst_5 [1] : vector<8x32xf32> to vector<8xf32>
    %18 = vector.shape_cast %17 : vector<8xf32> to vector<8x1xf32>
    %19 = arith.subf %9, %18 : vector<8x1xf32>
    %20 = arith.mulf %6, %5 : vector<8x32xf32>
    %cst_6 = arith.constant dense<0.000000e+00> : vector<8xf32>
    %21 = vector.multi_reduction <add>, %20, %cst_6 [1] : vector<8x32xf32> to vector<8xf32>
    %22 = vector.shape_cast %21 : vector<8xf32> to vector<8x1xf32>
    %23 = arith.mulf %22, %10 : vector<8x1xf32>
    %24 = arith.subf %9, %23 : vector<8x1xf32>
    %25 = vector.shape_cast %19 : vector<8x1xf32> to vector<1x8x1xf32>
    %cst_7 = arith.constant dense<0.000000e+00> : vector<1xf32>
    %26 = vector.multi_reduction <add>, %25, %cst_7 [1, 2] : vector<1x8x1xf32> to vector<1xf32>
    %27 = vector.shape_cast %26 : vector<1xf32> to vector<1x1x1xf32>
    %28 = vector.extract %27[0, 0, 0] : f32 from vector<1x1x1xf32>
    %29 = vector.shape_cast %24 : vector<8x1xf32> to vector<1x8x1xf32>
    %cst_8 = arith.constant dense<0.000000e+00> : vector<1xf32>
    %30 = vector.multi_reduction <add>, %29, %cst_8 [1, 2] : vector<1x8x1xf32> to vector<1xf32>
    %31 = vector.shape_cast %30 : vector<1xf32> to vector<1x1x1xf32>
    %32 = vector.extract %31[0, 0, 0] : f32 from vector<1x1x1xf32>
    %33 = tpu.iota {dimensions = array<i32: 1>} : vector<8x128xi32>
    %c0_i32 = arith.constant 0 : i32
    %34 = vector.broadcast %c0_i32 : i32 to vector<8x128xi32>
    %35 = arith.cmpi eq, %33, %34 : vector<8x128xi32>
    %c1_i32 = arith.constant 1 : i32
    %36 = vector.broadcast %c1_i32 : i32 to vector<8x128xi32>
    %37 = arith.cmpi eq, %33, %36 : vector<8x128xi32>
    %c2_i32 = arith.constant 2 : i32
    %38 = vector.broadcast %c2_i32 : i32 to vector<8x128xi32>
    %39 = arith.cmpi eq, %33, %38 : vector<8x128xi32>
    %cst_9 = arith.constant 0.000000e+00 : f32
    %40 = vector.broadcast %32 : f32 to vector<8x128xf32>
    %41 = vector.broadcast %cst_9 : f32 to vector<8x128xf32>
    %42 = arith.select %39, %40, %41 : vector<8x128xi1>, vector<8x128xf32>
    %cst_10 = arith.constant 0.000000e+00 : f32
    %43 = vector.broadcast %cst_10 : f32 to vector<8x128xf32>
    %44 = arith.select %37, %43, %42 : vector<8x128xi1>, vector<8x128xf32>
    %45 = vector.broadcast %28 : f32 to vector<8x128xf32>
    %46 = arith.select %35, %45, %44 : vector<8x128xi1>, vector<8x128xf32>
    %c0_11 = arith.constant 0 : index
    %c0_12 = arith.constant 0 : index
    %47 = vector.load %arg3[%c0_11, %c0_12] : memref<8x128xf32, #tpu.memory_space<vmem>>, vector<8x128xf32>
    tpu.vector_store %arg3[%c0_11, %c0_12], %46 {strides = array<i32>} : memref<8x128xf32, #tpu.memory_space<vmem>>, vector<8x128xf32>,
    return
  }
  func.func @transform_0(%arg0: i32) -> (i32, i32) {
    %c0_i32 = arith.constant 0 : i32
    %c0_i32_0 = arith.constant 0 : i32
    return %arg0, %c0_i32 : i32, i32
  }
  func.func @transform_1(%arg0: i32) -> (i32, i32) {
    %c0_i32 = arith.constant 0 : i32
    %c0_i32_0 = arith.constant 0 : i32
    return %arg0, %c0_i32 : i32, i32
  }
  func.func @transform_2(%arg0: i32) -> (i32, i32) {
    %c0_i32 = arith.constant 0 : i32
    %c0_i32_0 = arith.constant 0 : i32
    return %arg0, %c0_i32 : i32, i32
  }
}

</mosaic_0001>

<bundles_post_ra>
// kernel: tpu_custom_call.1
= control target key start
LH: loop header
LB: loop body
LE: loop exit
PB: predicated region body
PF: predicated region fallthrough
CT: control target
= control target key end

     0   :  { %vm14_vm0 = vcmask 261120   ;;  %s164_s0 = inlined_call_operand.vmem [shape: f32[8,32], index: 0, kind: input, shape index: {}]   ;;  %s165_s1 = inlined_call_operand.vmem [shape: s32[8,1], index: 1, kind: input, shape index: {}]   ;;  %s166_s2 = inlined_call_operand.hbm [shape: f32[8,128], index: 2, kind: output, shape index: {}]  }
   0x1   :  { %v12_v0 = vld [vmem:[%s164_s0] sm:$0xff] }
   0x2   :  { %7 = vsyncpa [#allocation3], 0  ;;  %v15_v1 = vsel %vm14_vm0, %v12_v0, -inf  ;;  %v125_v2 = vmov 0   ;;  %v13_v3 = vld [vmem:[%s165_s1] sm:$0xff]  ;;  %v27_v7 = vlaneseq  ;;  %vm44_vm2 = vcmask 7168  }
   0x3   :  { %94 = vset.pattern.permute.xlu0 %v125_v2  ;;  %s126_s13 = smov [#allocation2]  }
   0x4   :  { %16 = vmax.xlane.f32.xlu0 %v15_v1  ;;  %v28_v8 = vand.u32 127, %v27_v7  ;;  %s80_s14 = sshll.u32 %s126_s13, 4  ;;  %s81_s14 = int_to_ptr.vmem [resolvable:$true] %s80_s14 }
   0x5   :  { %s101_s15 = scalar_lea.vmem %s81_s14, 128  ;;  %p106_p1 = scmp.lt.s32.totalorder %s81_s14, %s81_s14 }
   0x6   :  { %vm67_vm3 = vcmp.eq.s32.totalorder %v28_v8, 2  ;;  %vm66_vm4 = vcmp.eq.s32.totalorder %v28_v8, 1  ;;  %vm65_vm5 = vcmp.eq.s32.totalorder %v28_v8, 0  ;;  %p102_p0 = scmp.ne.s32.totalorder %s81_s14, %s101_s15  ;;  %p107_p2 = scmp.lt.s32.totalorder %s101_s15, %s101_s15 }
   0x8   :  { %p108_p3 = por %p107_p2, %p106_p1 }
   0xa   :  { %p109_p4 = pnand %p108_p3, %p102_p0 }
  0x1a   :  { %30 = vperm.xlu0 %94, %v13_v3  }
  0x91   :  { %v17_v4 = vpop.xlane.xlu0 %16 }
  0x92   :  { %v18_v5 = vsub.f32 %v12_v0, %v17_v4 }
  0x94   :  { %v19_v6 = vmul.f32 1.442695, %v18_v5 }
  0x96   :  { %95 = vpow2.f32 %v19_v6 }
  0x99   :  { %v31_v10 = vpop.permute.xlu0 %30 }
  0x9a   :  { %vm32_vm1 = vcmp.eq.s32.totalorder %v28_v8, %v31_v10 }
  0x9b   :  { %v33_v14 = vsel %vm32_vm1, %v18_v5, 0.0 }
  0x9c   :  { %v34_v15 = vsel %vm14_vm0, %v33_v14, 0.0 }
  0xa0   :  { %v96_v9 = vpop.eup %95 }
  0xa1   :  { %v21_v11 = vsel %vm14_vm0, %v96_v9, 0.0  ;;  %v38_v12 = vmul.f32 %v96_v9, %v18_v5 }
  0xa2   :  { %22 = vadd.xlane.f32.xlu1 %v21_v11 }
  0xa3   :  { %v39_v13 = vsel %vm14_vm0, %v38_v12, 0.0 }
  0xa6   :  { %40 = vadd.xlane.f32.xlu1 %v39_v13 }
  0xaa   :  { %35 = vadd.xlane.f32.xlu1 %v34_v15 }
 0x12f   :  { %v23_v16 = vpop.xlane.xlu1 %22 }
 0x130   :  { %97 = vlog2.f32 %v23_v16 }
 0x131   :  { %99 = vrcp.f32 %v23_v16 }
 0x133   :  { %v41_v17 = vpop.xlane.xlu1 %40 }
 0x137   :  { %v36_v22 = vpop.xlane.xlu1 %35 }
 0x13a   :  { %v98_v18 = vpop.eup %97 }
 0x13b   :  { %v100_v19 = vpop.eup %99  ;;  %v25_v20 = vmul.f32 0.6931472, %v98_v18 }
 0x13c   :  { %v42_v21 = vmul.f32 %v100_v19, %v41_v17 }
 0x13d   :  { %v37_v23 = vsub.f32 %v25_v20, %v36_v22 }
 0x13e   :  { %v43_v25 = vsub.f32 %v25_v20, %v42_v21 }
 0x13f   :  { %v45_v24 = vsel %vm44_vm2, %v37_v23, 0.0 }
 0x140   :  { %46 = vadd.xlane.f32.xlu1 %v45_v24  ;;  %v55_v26 = vsel %vm44_vm2, %v43_v25, 0.0 }
 0x144   :  { %56 = vadd.xlane.f32.xlu1 %v55_v26 }
 0x1cd   :  { %v47_v27 = vpop.xlane.xlu1 %46 }
 0x1ce   :  { %v48_v28 = vrot.slane %v47_v27, 4 }
 0x1d0   :  { %v49_v29 = vadd.f32 %v48_v28, %v47_v27 }
 0x1d1   :  { %v57_v30 = vpop.xlane.xlu1 %56 }
 0x1d2   :  { %v50_v31 = vrot.slane %v49_v29, 2  ;;  %v58_v32 = vrot.slane %v57_v30, 4 }
 0x1d4   :  { %v59_v33 = vadd.f32 %v58_v32, %v57_v30  ;;  %v51_v34 = vadd.f32 %v50_v31, %v49_v29 }
 0x1d6   :  { %v60_v35 = vrot.slane %v59_v33, 2  ;;  %v52_v36 = vrot.slane %v51_v34, 1 }
 0x1d8   :  { %v61_v37 = vadd.f32 %v60_v35, %v59_v33  ;;  %v53_v38 = vadd.f32 %v52_v36, %v51_v34 }
 0x1da   :  { %88 = vpush %v53_v38  ;;  %v62_v39 = vrot.slane %v61_v37, 1 }
 0x1dc   :  { %v63_v40 = vadd.f32 %v62_v39, %v61_v37 }
 0x1de   :  { %90 = vpush %v63_v40 }
 0x20b   :  { %s89_s0 = spop %88 }
 0x20c   :  { %v71_v43 = vstv %s89_s0 }
 0x20f   :  { %s91_s1 = spop %90 }
 0x210   :  { %v68_v41 = vstv %s91_s1 }
 0x211   :  { %v69_v42 = vsel %vm67_vm3, %v68_v41, 0.0 }
 0x212   :  { %v70_v44 = vsel %vm66_vm4, 0.0, %v69_v42 }
 0x213   :  { %v72_v45 = vsel %vm65_vm5, %v71_v43, %v70_v44 }
 0x214   :  { %73 = vst [vmem:[#allocation2] sm:$0xff] %v72_v45 }
 0x215   :  { %112 = shalt.err (!%p109_p4)
}
 0x216   :  { %s113_s18 = scalar_lea.hbm %s166_s2, 128 }
 0x217   :  { %p114_p5 = scmp.ne.s32.totalorder %s166_s2, %s113_s18  ;;  %p117_p6 = scmp.lt.u32.totalorder %s113_s18, %s166_s2 }
 0x219   :  { %p119_p7 = pnand %p117_p6, %p114_p5 }
 0x21b   :  { %122 = shalt.err (!%p119_p7)
}
 0x21c   :  { %83 = dma.vmem_to_hbm [thread:$0]  %s81_s14, 128, %s166_s2, [#allocation3]  }
 0x21d   :  { %123 = dma.done.wait [#allocation3], 128  }
 0x21e   :  { %124 = vsyncadd [#allocation3], 4294967168 }
 0x21f   :  { %87 = vsyncpa [#allocation3], 1 }

</bundles_post_ra>
